<compile_context>
chip_gen: v7x
topology: tpu7x:2x2x1
jax: 0.10.0
libtpu: 0.0.40
codegen_flags: <defaults>
</compile_context>

<pallas_src>
import math
from functools import partial

import jax
import jax.numpy as jnp
from jax import lax
from jax.experimental import pallas as pl
from jax.experimental.pallas import tpu as pltpu


# --------------------------------------------------------------------------- #
# Prologue: lane-dense linear projection  y = x @ w + b                        #
# --------------------------------------------------------------------------- #
def _proj_kernel(x_ref, w_ref, b_ref, o_ref):
    o_ref[...] = (jnp.dot(x_ref[...], w_ref[...],
                          preferred_element_type=jnp.float32)
                  + b_ref[...]).astype(o_ref.dtype)


def _project(x, w, b, *, block_m):
    """x (M, d_in) bf16, w (d_in, d_out) bf16, b (1, d_out) f32 -> (M, d_out) bf16."""
    M, d_in = x.shape
    d_out = w.shape[1]
    tm = min(block_m, M)
    assert M % tm == 0, "row count must divide the projection tile size"
    # TODO(synk): add a k-loop grid axis if d_model grows past a few thousand.
    return pl.pallas_call(
        _proj_kernel,
        out_shape=jax.ShapeDtypeStruct((M, d_out), jnp.bfloat16),
        grid_spec=pltpu.PrefetchScalarGridSpec(
            num_scalar_prefetch=0,
            grid=(M // tm,),
            in_specs=[
                pl.BlockSpec((tm, d_in), lambda i: (i, 0)),
                pl.BlockSpec((d_in, d_out), lambda i: (0, 0)),
                pl.BlockSpec((1, d_out), lambda i: (0, 0)),
            ],
            out_specs=pl.BlockSpec((tm, d_out), lambda i: (i, 0)),
        ),
        compiler_params=pltpu.CompilerParams(
            dimension_semantics=("parallel",),
        ),
    )(x, w, b)


# --------------------------------------------------------------------------- #
# Flash attention kernel on pre-projected Q/K/V                                #
# --------------------------------------------------------------------------- #
def _flash_attn_kernel(qp_ref, kp_ref, vp_ref, wo_ref, bo_ref, out_ref,
                       m_scr, l_scr, acc_scr, *, h, d_k, d_v):
    """Grid = (batch, q_tiles, kv_tiles).

    qp_ref : (tq, h*d_k) bf16 (1/sqrt(d_k) pre-folded into Wq/bq)
    kp_ref : (tk, h*d_k) bf16          vp_ref : (tk, h*d_v) bf16
    wo_ref : (h*d_v, d_model) bf16     bo_ref : (1, d_model) f32
    out_ref: (tq, d_model)
    scratch: m/l (h, tq, 1) f32, acc (h, tq, d_v) f32
    """
    ki = pl.program_id(2)

    @pl.when(ki == 0)
    def _init():
        m_scr[...] = jnp.full_like(m_scr, -jnp.inf)
        l_scr[...] = jnp.zeros_like(l_scr)
        acc_scr[...] = jnp.zeros_like(acc_scr)

    qp = qp_ref[...]          # resident across the kv loop (block index fixed in ki)
    kp = kp_ref[...]
    vp = vp_ref[...]

    # Per-head online softmax.  h is small and static, so the Python loop fully
    # unrolls at trace time and the live intermediates are (tq, tk), not
    # (h, tq, tk).  Head slices are static slices of the dense bf16 tiles.
    # TODO(synk): for large h switch to lax.fori_loop(unroll=True) over a
    # head-major layout so unrolled live ranges stay bounded.
    for j in range(h):
        q_h = qp[:, j * d_k:(j + 1) * d_k]               # (tq, d_k)
        k_h = kp[:, j * d_k:(j + 1) * d_k]               # (tk, d_k)
        v_h = vp[:, j * d_v:(j + 1) * d_v]               # (tk, d_v)

        # Scores: contraction over the last dims -> no explicit K transpose.
        s = lax.dot_general(q_h, k_h, (((1,), (1,)), ((), ())),
                            preferred_element_type=jnp.float32)   # (tq, tk) f32

        m_prev = m_scr[j]                                # (tq, 1) f32
        m_new = jnp.maximum(m_prev, jnp.max(s, axis=-1, keepdims=True))
        alpha = jnp.exp(m_prev - m_new)                  # f32 element-wise (v5e-safe)
        p = jnp.exp(s - m_new)
        l_scr[j] = alpha * l_scr[j] + jnp.sum(p, axis=-1, keepdims=True)
        acc_scr[j] = alpha * acc_scr[j] + jnp.dot(
            p.astype(jnp.bfloat16), v_h, preferred_element_type=jnp.float32)
        m_scr[j] = m_new

    @pl.when(ki == pl.num_programs(2) - 1)
    def _finalize():
        inv_l = pl.reciprocal(l_scr[...], approx=True)   # (h, tq, 1) -> EUP slot
        o = (acc_scr[...] * inv_l).astype(jnp.bfloat16)  # (h, tq, d_v)
        # Single lane-dense output projection: (tq, h*d_v) @ (h*d_v, d_model).
        # One head concat per q-tile; K = h*d_v fills the MXU contraction depth.
        o_flat = jnp.concatenate([o[j] for j in range(h)], axis=-1)
        out_ref[...] = (jnp.dot(o_flat, wo_ref[...],
                                preferred_element_type=jnp.float32)
                        + bo_ref[...]).astype(out_ref.dtype)

    # TODO(synk): attention_mask / attention_weights optional inputs of the
    # PyTorch forward are not plumbed through; default (None) path only.


def _vmem_limit_bytes():
    """Scoped-VMEM budget derived from the chip (v7x has only 64 MiB physical)."""
    try:
        cap = pltpu.get_tpu_info().vmem_capacity_bytes
        return int(min(cap * 3 // 4, 64 * 1024 * 1024))
    except Exception:
        return 32 * 1024 * 1024


def scaled_dot_product_attention(queries, keys, values, params, *, h, d_k, d_v,
                                 block_q=256, block_k=256, block_proj=512):
    """Pallas forward pass matching ScaledDotProductAttention.forward (no mask).

    Defaults target v6e/v7x (256-wide MXU): tq = tk = 256.  On v5e prefer
    block_k=128 (128-wide MXU) and grow block_q only.
    """
    b_s, nq, d_model = queries.shape
    nk = keys.shape[1]
    wq, bq, wk, bk, wv, bv, wo, bo = params

    tq = min(block_q, nq)
    tk = min(block_k, nk)
    assert nq % tq == 0 and nk % tk == 0, "sequence lengths must divide the tile sizes"

    scale = 1.0 / math.sqrt(d_k)

    # bf16 weights (MXU operand dtype); 1/sqrt(d_k) folded into the Q projection.
    # TODO(synk): on v7x the projection weights could be cast to fp8 for 2x MXU
    # throughput (needs per-generation dispatch + accuracy validation).
    wq_s = (wq * scale).astype(jnp.bfloat16)
    wk_b = wk.astype(jnp.bfloat16)
    wv_b = wv.astype(jnp.bfloat16)
    wo_b = wo.astype(jnp.bfloat16)
    bq_s = (bq.reshape(1, h * d_k) * scale).astype(jnp.float32)
    bk_r = bk.reshape(1, h * d_k).astype(jnp.float32)
    bv_r = bv.reshape(1, h * d_v).astype(jnp.float32)
    bo_r = bo.reshape(1, d_model).astype(jnp.float32)

    # Prologue: projections computed ONCE (not per q-tile / kv-tile), each as a
    # single lane-dense matmul.  Projected tensors are the same size as the raw
    # inputs here, so HBM traffic is unchanged while the MXU recompute is gone.
    q_rows = queries.astype(jnp.bfloat16).reshape(b_s * nq, d_model)
    k_rows = keys.astype(jnp.bfloat16).reshape(b_s * nk, d_model)
    v_rows = values.astype(jnp.bfloat16).reshape(b_s * nk, d_model)
    qp = _project(q_rows, wq_s, bq_s, block_m=block_proj).reshape(b_s, nq, h * d_k)
    kp = _project(k_rows, wk_b, bk_r, block_m=block_proj).reshape(b_s, nk, h * d_k)
    vp = _project(v_rows, wv_b, bv_r, block_m=block_proj).reshape(b_s, nk, h * d_v)

    grid = (b_s, nq // tq, nk // tk)
    # TODO(synk): at large d_model mark the wo/bo BlockSpecs pipeline_mode=
    # pl.Buffered(1) (or DMA them once from pl.ANY) so resident weights are not
    # double-buffered; trivial at d_model = 128.
    grid_spec = pltpu.PrefetchScalarGridSpec(
        num_scalar_prefetch=0,
        grid=grid,
        in_specs=[
            pl.BlockSpec((None, tq, h * d_k), lambda b, qi, ki: (b, qi, 0)),  # Q proj
            pl.BlockSpec((None, tk, h * d_k), lambda b, qi, ki: (b, ki, 0)),  # K proj
            pl.BlockSpec((None, tk, h * d_v), lambda b, qi, ki: (b, ki, 0)),  # V proj
            pl.BlockSpec((h * d_v, d_model), lambda b, qi, ki: (0, 0)),       # Wo
            pl.BlockSpec((1, d_model), lambda b, qi, ki: (0, 0)),             # bo
        ],
        out_specs=pl.BlockSpec((None, tq, d_model), lambda b, qi, ki: (b, qi, 0)),
        scratch_shapes=[
            pltpu.VMEM((h, tq, 1), jnp.float32),    # running max m
            pltpu.VMEM((h, tq, 1), jnp.float32),    # running denom l
            pltpu.VMEM((h, tq, d_v), jnp.float32),  # per-head output accumulator
        ],
    )

    return pl.pallas_call(
        partial(_flash_attn_kernel, h=h, d_k=d_k, d_v=d_v),
        out_shape=jax.ShapeDtypeStruct((b_s, nq, d_model), queries.dtype),
        grid_spec=grid_spec,
        compiler_params=pltpu.CompilerParams(
            dimension_semantics=("parallel", "parallel", "arbitrary"),
            vmem_limit_bytes=_vmem_limit_bytes(),
        ),
    )(qp, kp, vp, wo_b, bo_r)


# --------------------------------------------------------------------------- #
# Parameter init (matches PyTorch init_weights) and pure-JAX reference         #
# --------------------------------------------------------------------------- #
def init_params(key, d_model, d_k, d_v, h):
    """Deterministic Xavier-uniform weights / zero biases (matches init_weights)."""
    def xavier_t(k, fan_in, fan_out):
        bound = math.sqrt(6.0 / (fan_in + fan_out))
        # PyTorch Linear weight is (out, in); we return its transpose (in, out).
        w = jax.random.uniform(k, (fan_out, fan_in), minval=-bound, maxval=bound,
                               dtype=jnp.float32)
        return jnp.transpose(w)

    kq, kk, kv, ko = jax.random.split(key, 4)
    wq = xavier_t(kq, d_model, h * d_k)
    wk = xavier_t(kk, d_model, h * d_k)
    wv = xavier_t(kv, d_model, h * d_v)
    wo = xavier_t(ko, h * d_v, d_model)
    bq = jnp.zeros((1, h * d_k), jnp.float32)
    bk = jnp.zeros((1, h * d_k), jnp.float32)
    bv = jnp.zeros((1, h * d_v), jnp.float32)
    bo = jnp.zeros((1, d_model), jnp.float32)
    return (wq, bq, wk, bk, wv, bv, wo, bo)


def reference_jax(queries, keys, values, params, *, h, d_k, d_v):
    """Pure-JAX fp32 reference mirroring the PyTorch forward (mask/weights = None)."""
    wq, bq, wk, bk, wv, bv, wo, bo = params
    b_s, nq, d_model = queries.shape
    nk = keys.shape[1]
    q = (queries @ wq + bq).reshape(b_s, nq, h, d_k).transpose(0, 2, 1, 3)
    k = (keys @ wk + bk).reshape(b_s, nk, h, d_k).transpose(0, 2, 3, 1)
    v = (values @ wv + bv).reshape(b_s, nk, h, d_v).transpose(0, 2, 1, 3)
    att = jnp.matmul(q, k) / math.sqrt(d_k)
    att = jax.nn.softmax(att, axis=-1)
    out = jnp.matmul(att, v).transpose(0, 2, 1, 3).reshape(b_s, nq, h * d_v)
    return out @ wo + bo


if __name__ == "__main__":
    # Lane-friendly demo config: d_model and h*d_k are multiples of 128; nk gives
    # two kv tiles so the online-softmax recurrence is actually exercised, and
    # batch * q_tiles = 2 so both v7x TensorCores get a parallel step.
    d_model, d_k, d_v, h = 128, 32, 32, 4
    b_s, nq, nk = 2, 256, 512

    key = jax.random.PRNGKey(0)
    k_par, k_q, k_k, k_v = jax.random.split(key, 4)

    params = init_params(k_par, d_model, d_k, d_v, h)
    queries = jax.random.normal(k_q, (b_s, nq, d_model), dtype=jnp.float32)
    keys = jax.random.normal(k_k, (b_s, nk, d_model), dtype=jnp.float32)
    values = jax.random.normal(k_v, (b_s, nk, d_model), dtype=jnp.float32)

    out = scaled_dot_product_attention(queries, keys, values, params,
                                       h=h, d_k=d_k, d_v=d_v)
    out = jax.block_until_ready(out)

    ref = reference_jax(queries, keys, values, params, h=h, d_k=d_k, d_v=d_v)
    assert out.shape == (b_s, nq, d_model)
    # bf16 MXU operands + approx reciprocal => slightly loosened tolerance vs fp32 ref.
    max_err = float(jnp.max(jnp.abs(out - ref)))
    assert jnp.allclose(out, ref, atol=5e-2, rtol=5e-2), f"max abs err = {max_err}"

    print("KERNEL_OK")
</pallas_src>

<mosaic_0001>
module attributes {stable_mosaic.version = 11 : i64} {
  func.func @_proj_kernel(%arg0: i32, %arg1: memref<512x128xbf16, #tpu.memory_space<vmem>>, %arg2: memref<128x128xbf16, #tpu.memory_space<vmem>>, %arg3: memref<1x128xf32, #tpu.memory_space<vmem>>, %arg4: memref<512x128xbf16, #tpu.memory_space<vmem>>) attributes {dimension_semantics = [#tpu.dimension_semantics<parallel>], iteration_bounds = array<i64: 1>, scalar_prefetch = 0 : i64, scratch_operands = 0 : i64, tpu.core_type = #tpu.core_type<tc>, window_params = [{transform_indices = @transform_0, window_bounds = array<i64: 512, 128>}, {pipeline_mode = #tpu.pipeline_mode<synchronous>, transform_indices = @transform_1, window_bounds = array<i64: 128, 128>}, {pipeline_mode = #tpu.pipeline_mode<synchronous>, transform_indices = @transform_2, window_bounds = array<i64: 1, 128>}, {transform_indices = @transform_3, window_bounds = array<i64: 512, 128>}]} {
    %c0 = arith.constant 0 : index
    %c0_0 = arith.constant 0 : index
    %0 = vector.load %arg1[%c0, %c0_0] : memref<512x128xbf16, #tpu.memory_space<vmem>>, vector<512x128xbf16>
    %c0_1 = arith.constant 0 : index
    %c0_2 = arith.constant 0 : index
    %1 = vector.load %arg2[%c0_1, %c0_2] : memref<128x128xbf16, #tpu.memory_space<vmem>>, vector<128x128xbf16>
    %cst = arith.constant dense<0.000000e+00> : vector<512x128xf32>
    %2 = tpu.matmul %0, %1, %cst {dimension_numbers = #tpu.dot_dimension_numbers<[1], [0], [0], [1], [0, 0, 1, 1], [], []>} : vector<512x128xbf16>, vector<128x128xbf16>, vector<512x128xf32> -> vector<512x128xf32>
    %c0_3 = arith.constant 0 : index
    %c0_4 = arith.constant 0 : index
    %3 = vector.load %arg3[%c0_3, %c0_4] : memref<1x128xf32, #tpu.memory_space<vmem>>, vector<1x128xf32>
    %4 = vector.broadcast %3 : vector<1x128xf32> to vector<512x128xf32>
    %5 = arith.addf %2, %4 : vector<512x128xf32>
    %6 = arith.truncf %5 : vector<512x128xf32> to vector<512x128xbf16>
    %c0_5 = arith.constant 0 : index
    %c0_6 = arith.constant 0 : index
    %7 = vector.load %arg4[%c0_5, %c0_6] : memref<512x128xbf16, #tpu.memory_space<vmem>>, vector<512x128xbf16>
    tpu.vector_store %arg4[%c0_5, %c0_6], %6 {strides = array<i32>} : memref<512x128xbf16, #tpu.memory_space<vmem>>, vector<512x128xbf16>,
    return
  }
  func.func @transform_0(%arg0: i32) -> (i32, i32) {
    %c0_i32 = arith.constant 0 : i32
    %c0_i32_0 = arith.constant 0 : i32
    return %arg0, %c0_i32 : i32, i32
  }
  func.func @transform_1(%arg0: i32) -> (i32, i32) {
    %c0_i32 = arith.constant 0 : i32
    %c0_i32_0 = arith.constant 0 : i32
    %c0_i32_1 = arith.constant 0 : i32
    return %c0_i32, %c0_i32_0 : i32, i32
  }
  func.func @transform_2(%arg0: i32) -> (i32, i32) {
    %c0_i32 = arith.constant 0 : i32
    %c0_i32_0 = arith.constant 0 : i32
    %c0_i32_1 = arith.constant 0 : i32
    return %c0_i32, %c0_i32_0 : i32, i32
  }
  func.func @transform_3(%arg0: i32) -> (i32, i32) {
    %c0_i32 = arith.constant 0 : i32
    %c0_i32_0 = arith.constant 0 : i32
    return %arg0, %c0_i32 : i32, i32
  }
}

</mosaic_0001>

<bundles_post_ra>
// kernel: tpu_custom_call.1
= control target key start
LH: loop header
LB: loop body
LE: loop exit
PB: predicated region body
PF: predicated region fallthrough
CT: control target
= control target key end

     0   :  { %8 = vsyncpa [#allocation3], 0  ;;  %s1750_s0 = inlined_call_operand.hbm [shape: bf16[512,128], index: 0, kind: input, shape index: {}]   ;;  %s1751_s1 = inlined_call_operand.hbm [shape: bf16[128,128], index: 1, kind: input, shape index: {}]   ;;  %s1752_s2 = inlined_call_operand.vmem [shape: f32[1,128], index: 2, kind: input, shape index: {}]   ;;  %s1753_s3 = inlined_call_operand.hbm [shape: bf16[512,128], index: 3, kind: output, shape index: {}]  }
   0x1   :  { %9 = vsyncpa [#allocation6], 0 }
   0x2   :  { %10 = vsyncpa [#allocation4], 0  ;;  %s1611_s12 = smov [#allocation2]   ;;  %s1539_s16 = scalar_lea.hbm %s1750_s0, 4096 }
   0x3   :  { %s16_s13 = sshll.u32 %s1611_s12, 4  ;;  %p1540_p0 = scmp.ne.s32.totalorder %s1750_s0, %s1539_s16  ;;  %s17_s13 = int_to_ptr.vmem [resolvable:$true] %s16_s13 }
   0x4   :  { %p1543_p1 = scmp.lt.u32.totalorder %s1539_s16, %s1750_s0 }
   0x6   :  { %p1545_p2 = pnand %p1543_p1, %p1540_p0 }
   0x8   :  { %1548 = shalt.err (!%p1545_p2)
}
   0x9   :  { %s1549_s21 = scalar_lea.vmem %s17_s13, 4096  ;;  %p1554_p4 = scmp.lt.s32.totalorder %s17_s13, %s17_s13 }
   0xa   :  { %p1550_p3 = scmp.ne.s32.totalorder %s17_s13, %s1549_s21  ;;  %p1555_p5 = scmp.lt.s32.totalorder %s1549_s21, %s1549_s21 }
   0xc   :  { %p1556_p6 = por %p1555_p5, %p1554_p4 }
   0xe   :  { %p1557_p7 = pnand %p1556_p6, %p1550_p3 }
  0x10   :  { %1560 = shalt.err (!%p1557_p7)
}
  0x11   :  { %s1612_s22 = smov 64   ;;  %s1613_s23 = smov 4  }
  0x12   :  { %22 = dma.hbm_to_vmem [thread:$0]  %s1750_s0, 4096, %s17_s13, [#allocation3], %s1612_s22, %s1612_s22, %s1613_s23  }
  0x13   :  { %s1614_s26 = smov [#allocation5]   ;;  %s1561_s30 = scalar_lea.hbm %s1751_s1, 1024 }
  0x14   :  { %s28_s27 = sshll.u32 %s1614_s26, 4  ;;  %p1562_p8 = scmp.ne.s32.totalorder %s1751_s1, %s1561_s30  ;;  %s29_s27 = int_to_ptr.vmem [resolvable:$true] %s28_s27 }
  0x15   :  { %p1565_p9 = scmp.lt.u32.totalorder %s1561_s30, %s1751_s1 }
  0x17   :  { %p1567_p10 = pnand %p1565_p9, %p1562_p8 }
  0x19   :  { %1570 = shalt.err (!%p1567_p10)
}
  0x1a   :  { %s1571_s8 = scalar_lea.vmem %s29_s27, 1024  ;;  %p1576_p12 = scmp.lt.s32.totalorder %s29_s27, %s29_s27 }
  0x1b   :  { %p1572_p11 = scmp.ne.s32.totalorder %s29_s27, %s1571_s8  ;;  %p1577_p13 = scmp.lt.s32.totalorder %s1571_s8, %s1571_s8 }
  0x1d   :  { %p1578_p0 = por %p1577_p13, %p1576_p12 }
  0x1f   :  { %p1579_p1 = pnand %p1578_p0, %p1572_p11 }
  0x21   :  { %1582 = shalt.err (!%p1579_p1)
}
  0x22   :  { %34 = dma.hbm_to_vmem [thread:$0]  %s1751_s1, 1024, %s29_s27, [#allocation6], %s1612_s22, %s1612_s22, %s1613_s23  }
  0x23   :  { %1605 = dma.done.wait [#allocation3], 4096  }
  0x24   :  { %1606 = vsyncadd [#allocation3], 4294963200 }
  0x25   :  { %1607 = dma.done.wait [#allocation6], 1024  }
  0x26   :  { %1608 = vsyncadd [#allocation6], 4294966272  ;;  %v1499_v0 = vld [vmem:[#allocation5] sm:$0xff]   ;;  %v1500_v1 = vld [vmem:[#allocation5 + $0x8] sm:$0xff]  }
  0x27   :  { %1398 = vmatprep.subr.bf16.mxu0 %v1499_v0  ;;  %1478 = vmatprep.subr.bf16.mxu1 %v1499_v0  ;;  %v1501_v2 = vld [vmem:[#allocation5 + $0x10] sm:$0xff]   ;;  %v1502_v3 = vld [vmem:[#allocation5 + $0x18] sm:$0xff]   ;;  %v1507_v4 = vld [vmem:[#allocation2] sm:$0xff]  }
  0x28   :  { %1399 = vmatpush3.bf16.msra.mxu0 %v1499_v0  ;;  %1486 = vmatpush3.bf16.msra.mxu1 %v1499_v0  ;;  %v1508_v5 = vld [vmem:[#allocation2 + $0x80] sm:$0xff]   ;;  %v1504_v7 = vld [vmem:[#allocation5 + $0x28] sm:$0xff]   ;;  %v1505_v8 = vld [vmem:[#allocation5 + $0x30] sm:$0xff]  }
  0x29   :  { %1400 = vmatprep.subr.bf16.mxu0 %v1500_v1  ;;  %1479 = vmatprep.subr.bf16.mxu1 %v1500_v1  ;;  %v1503_v6 = vld [vmem:[#allocation5 + $0x20] sm:$0xff]   ;;  %v1506_v9 = vld [vmem:[#allocation5 + $0x38] sm:$0xff]   ;;  %v1509_v10 = vld [vmem:[#allocation2 + $0x8] sm:$0xff]  }
  0x2a   :  { %1414 = vmatprep.mubr.bf16.mxu0 %v1507_v4  ;;  %1446 = vmatprep.mubr.bf16.mxu1 %v1508_v5  ;;  %v1510_v11 = vld [vmem:[#allocation2 + $0x88] sm:$0xff]   ;;  %v1511_v12 = vld [vmem:[#allocation2 + $0x10] sm:$0xff]   ;;  %v1513_v14 = vld [vmem:[#allocation2 + $0x18] sm:$0xff]  }
  0x2b   :  { %v1512_v13 = vld [vmem:[#allocation2 + $0x90] sm:$0xff]   ;;  %v1514_v15 = vld [vmem:[#allocation2 + $0x98] sm:$0xff]   ;;  %v1515_v16 = vld [vmem:[#allocation2 + $0x20] sm:$0xff]  }
  0x2c   :  { %1401 = vmatpush3.bf16.msra.mxu0 %v1500_v1  ;;  %1487 = vmatpush3.bf16.msra.mxu1 %v1500_v1  ;;  %v1516_v17 = vld [vmem:[#allocation2 + $0xa0] sm:$0xff]   ;;  %v1517_v18 = vld [vmem:[#allocation2 + $0x28] sm:$0xff]   ;;  %v1519_v20 = vld [vmem:[#allocation2 + $0x30] sm:$0xff]  }
  0x2d   :  { %1402 = vmatprep.subr.bf16.mxu0 %v1501_v2  ;;  %1480 = vmatprep.subr.bf16.mxu1 %v1501_v2  ;;  %v1518_v19 = vld [vmem:[#allocation2 + $0xa8] sm:$0xff]   ;;  %v1520_v21 = vld [vmem:[#allocation2 + $0xb0] sm:$0xff]   ;;  %v1521_v22 = vld [vmem:[#allocation2 + $0x38] sm:$0xff]  }
  0x2e   :  { %v1522_v23 = vld [vmem:[#allocation2 + $0xb8] sm:$0xff]   ;;  %v1523_v24 = vld [vmem:[#allocation2 + $0x40] sm:$0xff]   ;;  %v1525_v26 = vld [vmem:[#allocation2 + $0x48] sm:$0xff]  }
  0x2f   :  { %v1524_v25 = vld [vmem:[#allocation2 + $0xc0] sm:$0xff]   ;;  %v1526_v27 = vld [vmem:[#allocation2 + $0xc8] sm:$0xff]   ;;  %v1527_v28 = vld [vmem:[#allocation2 + $0x50] sm:$0xff]  }
  0x30   :  { %1403 = vmatpush3.bf16.msra.mxu0 %v1501_v2  ;;  %1488 = vmatpush3.bf16.msra.mxu1 %v1501_v2  ;;  %v1528_v29 = vld [vmem:[#allocation2 + $0xd0] sm:$0xff]   ;;  %v1529_v30 = vld [vmem:[#allocation2 + $0x58] sm:$0xff]   ;;  %v1531_v32 = vld [vmem:[#allocation2 + $0x60] sm:$0xff]  }
  0x31   :  { %1404 = vmatprep.subr.bf16.mxu0 %v1502_v3  ;;  %1481 = vmatprep.subr.bf16.mxu1 %v1502_v3  ;;  %v1530_v31 = vld [vmem:[#allocation2 + $0xd8] sm:$0xff]   ;;  %v1532_v33 = vld [vmem:[#allocation2 + $0xe0] sm:$0xff]   ;;  %v1533_v34 = vld [vmem:[#allocation2 + $0x68] sm:$0xff]  }
  0x32   :  { %v1534_v35 = vld [vmem:[#allocation2 + $0xe8] sm:$0xff]   ;;  %v1535_v36 = vld [vmem:[#allocation2 + $0x70] sm:$0xff]   ;;  %v1537_v38 = vld [vmem:[#allocation2 + $0x78] sm:$0xff]  }
  0x33   :  { %v1536_v37 = vld [vmem:[#allocation2 + $0xf0] sm:$0xff]   ;;  %v1538_v39 = vld [vmem:[#allocation2 + $0xf8] sm:$0xff]   ;;  %v1669_v41 = vld [vmem:[%s1752_s2] ss:$0 sm:$0xff]  ;;  %s1615_s2 = smov [#allocation7]  }
  0x34   :  { %1405 = vmatpush3.bf16.msra.mxu0 %v1502_v3  ;;  %1489 = vmatpush3.bf16.msra.mxu1 %v1502_v3  ;;  %s985_s11 = sshll.u32 %s1615_s2, 4  ;;  %s986_s11 = int_to_ptr.vmem [resolvable:$true] %s985_s11 }
  0x35   :  { %1406 = vmatprep.subr.bf16.mxu0 %v1503_v6  ;;  %1482 = vmatprep.subr.bf16.mxu1 %v1503_v6  ;;  %s1583_s12 = scalar_lea.vmem %s986_s11, 4096  ;;  %p1588_p3 = scmp.lt.s32.totalorder %s986_s11, %s986_s11 }
  0x36   :  { %p1584_p2 = scmp.ne.s32.totalorder %s986_s11, %s1583_s12  ;;  %p1589_p4 = scmp.lt.s32.totalorder %s1583_s12, %s1583_s12 }
  0x38   :  { %1407 = vmatpush3.bf16.msra.mxu0 %v1503_v6  ;;  %1490 = vmatpush3.bf16.msra.mxu1 %v1503_v6  ;;  %p1590_p5 = por %p1589_p4, %p1588_p3 }
  0x39   :  { %1408 = vmatprep.subr.bf16.mxu0 %v1504_v7  ;;  %1483 = vmatprep.subr.bf16.mxu1 %v1504_v7 }
  0x3a   :  { %p1591_p6 = pnand %p1590_p5, %p1584_p2 }
  0x3c   :  { %1409 = vmatpush3.bf16.msra.mxu0 %v1504_v7  ;;  %1491 = vmatpush3.bf16.msra.mxu1 %v1504_v7 }
  0x3d   :  { %1410 = vmatprep.subr.bf16.mxu0 %v1505_v8  ;;  %1484 = vmatprep.subr.bf16.mxu1 %v1505_v8 }
  0x40   :  { %1411 = vmatpush3.bf16.msra.mxu0 %v1505_v8  ;;  %1492 = vmatpush3.bf16.msra.mxu1 %v1505_v8 }
  0x41   :  { %1412 = vmatprep.subr.bf16.mxu0 %v1506_v9  ;;  %1485 = vmatprep.subr.bf16.mxu1 %v1506_v9 }
  0x44   :  { %1413 = vmatpush3.bf16.msra.mxu0 %v1506_v9  ;;  %1493 = vmatpush3.bf16.msra.mxu1 %v1506_v9 }
  0x47   :  { %1415 = vmatmul.mubr.bf16.vlgmr.msra.gmra.mrb[0].mxu0 %v1509_v10  ;;  %1447 = vmatmul.mubr.bf16.vlgmr.msra.gmra.mrb[0].mxu1 %v1510_v11 }
  0x48   :  { %1418 = vmatprep.mubr.bf16.mxu0 %v1511_v12  ;;  %1450 = vmatprep.mubr.bf16.mxu1 %v1512_v13 }
  0x4f   :  { %1419 = vmatmul.mubr.bf16.gmra.mrb[4].mxu0 %v1513_v14  ;;  %1451 = vmatmul.mubr.bf16.gmra.mrb[4].mxu1 %v1514_v15 }
  0x50   :  { %1422 = vmatprep.mubr.bf16.mxu0 %v1515_v16  ;;  %1454 = vmatprep.mubr.bf16.mxu1 %v1516_v17 }
  0x57   :  { %1423 = vmatmul.mubr.bf16.gmra.mrb[8].mxu0 %v1517_v18  ;;  %1455 = vmatmul.mubr.bf16.gmra.mrb[8].mxu1 %v1518_v19 }
  0x58   :  { %1426 = vmatprep.mubr.bf16.mxu0 %v1519_v20  ;;  %1458 = vmatprep.mubr.bf16.mxu1 %v1520_v21 }
  0x5f   :  { %1427 = vmatmul.mubr.bf16.gmra.mrb[12].mxu0 %v1521_v22  ;;  %1459 = vmatmul.mubr.bf16.gmra.mrb[12].mxu1 %v1522_v23 }
  0x60   :  { %1430 = vmatprep.mubr.bf16.mxu0 %v1523_v24  ;;  %1462 = vmatprep.mubr.bf16.mxu1 %v1524_v25 }
  0x67   :  { %1431 = vmatmul.mubr.bf16.gmra.mrb[16].mxu0 %v1525_v26  ;;  %1463 = vmatmul.mubr.bf16.gmra.mrb[16].mxu1 %v1526_v27 }
  0x68   :  { %1434 = vmatprep.mubr.bf16.mxu0 %v1527_v28  ;;  %1466 = vmatprep.mubr.bf16.mxu1 %v1528_v29 }
  0x6f   :  { %1435 = vmatmul.mubr.bf16.gmra.mrb[20].mxu0 %v1529_v30  ;;  %1467 = vmatmul.mubr.bf16.gmra.mrb[20].mxu1 %v1530_v31 }
  0x70   :  { %1438 = vmatprep.mubr.bf16.mxu0 %v1531_v32  ;;  %1470 = vmatprep.mubr.bf16.mxu1 %v1532_v33 }
  0x77   :  { %1439 = vmatmul.mubr.bf16.gmra.mrb[24].mxu0 %v1533_v34  ;;  %1471 = vmatmul.mubr.bf16.gmra.mrb[24].mxu1 %v1534_v35 }
  0x78   :  { %1442 = vmatprep.mubr.bf16.mxu0 %v1535_v36  ;;  %1474 = vmatprep.mubr.bf16.mxu1 %v1536_v37 }
  0x7f   :  { %1443 = vmatmul.mubr.bf16.gmra.mrb[28].mxu0 %v1537_v38  ;;  %1475 = vmatmul.mubr.bf16.gmra.mrb[28].mxu1 %v1538_v39 }
 0x11a   :  { %v1416_v40 = vpop.f32.mrb[0].mxu0  ;;  %v1448_v42 = vpop.f32.mrb[0].mxu1 }
 0x11b   :  { %v405_v43 = vpop.f32.mrb[1].mxu0  ;;  %v533_v44 = vpop.f32.mrb[1].mxu1  ;;  %v414_v47 = vadd.f32 %v1416_v40, %v1669_v41  ;;  %v542_v48 = vadd.f32 %v1448_v42, %v1669_v41 }
 0x11c   :  { %v1417_v45 = vpop.f32.mrb[2].mxu0  ;;  %v1449_v46 = vpop.f32.mrb[2].mxu1  ;;  %v406_v53 = vadd.f32 %v1669_v41, %v405_v43  ;;  %v534_v54 = vadd.f32 %v1669_v41, %v533_v44 }
 0x11d   :  { %v417_v49 = vadd.f32 %v1417_v45, %v1669_v41  ;;  %v545_v50 = vadd.f32 %v1449_v46, %v1669_v41  ;;  %v408_v51 = vpop.f32.mrb[3].mxu0  ;;  %v536_v52 = vpop.f32.mrb[3].mxu1 }
 0x11e   :  { %v409_v55 = vadd.f32 %v1669_v41, %v408_v51  ;;  %v537_v56 = vadd.f32 %v1669_v41, %v536_v52 }
 0x11f   :  { %v1175_v57 = vpack.c.bf16 %v417_v49, %v414_v47  ;;  %v1255_v58 = vpack.c.bf16 %v545_v50, %v542_v48 }
 0x120   :  { %v1170_v59 = vpack.c.bf16 %v409_v55, %v406_v53  ;;  %v1250_v60 = vpack.c.bf16 %v537_v56, %v534_v54 }
 0x121   :  { %1327 = vst [vmem:[#allocation7 + $0x8] sm:$0xff] %v1175_v57   ;;  %1343 = vst [vmem:[#allocation7 + $0x88] sm:$0xff] %v1255_v58  }
 0x122   :  { %1171 = vst [vmem:[#allocation7] sm:$0xff] %v1170_v59   ;;  %1342 = vst [vmem:[#allocation7 + $0x80] sm:$0xff] %v1250_v60   ;;  %v1420_v61 = vpop.f32.mrb[4].mxu0  ;;  %v1452_v62 = vpop.f32.mrb[4].mxu1 }
 0x123   :  { %v421_v63 = vpop.f32.mrb[5].mxu0  ;;  %v549_v0 = vpop.f32.mrb[5].mxu1  ;;  %v430_v3 = vadd.f32 %v1420_v61, %v1669_v41  ;;  %v558_v4 = vadd.f32 %v1452_v62, %v1669_v41 }
 0x124   :  { %v1421_v1 = vpop.f32.mrb[6].mxu0  ;;  %v1453_v2 = vpop.f32.mrb[6].mxu1  ;;  %v422_v9 = vadd.f32 %v1669_v41, %v421_v63  ;;  %v550_v10 = vadd.f32 %v1669_v41, %v549_v0 }
 0x125   :  { %v433_v5 = vadd.f32 %v1421_v1, %v1669_v41  ;;  %v561_v6 = vadd.f32 %v1453_v2, %v1669_v41  ;;  %v424_v7 = vpop.f32.mrb[7].mxu0  ;;  %v552_v8 = vpop.f32.mrb[7].mxu1 }
 0x126   :  { %v425_v11 = vadd.f32 %v1669_v41, %v424_v7  ;;  %v553_v12 = vadd.f32 %v1669_v41, %v552_v8 }
 0x127   :  { %v1185_v13 = vpack.c.bf16 %v433_v5, %v430_v3  ;;  %v1265_v14 = vpack.c.bf16 %v561_v6, %v558_v4 }
 0x128   :  { %v1180_v15 = vpack.c.bf16 %v425_v11, %v422_v9  ;;  %v1260_v16 = vpack.c.bf16 %v553_v12, %v550_v10 }
 0x129   :  { %1329 = vst [vmem:[#allocation7 + $0x18] sm:$0xff] %v1185_v13   ;;  %1345 = vst [vmem:[#allocation7 + $0x98] sm:$0xff] %v1265_v14  }
 0x12a   :  { %1328 = vst [vmem:[#allocation7 + $0x10] sm:$0xff] %v1180_v15   ;;  %1344 = vst [vmem:[#allocation7 + $0x90] sm:$0xff] %v1260_v16   ;;  %v1424_v17 = vpop.f32.mrb[8].mxu0  ;;  %v1456_v18 = vpop.f32.mrb[8].mxu1 }
 0x12b   :  { %v437_v19 = vpop.f32.mrb[9].mxu0  ;;  %v565_v20 = vpop.f32.mrb[9].mxu1  ;;  %v446_v23 = vadd.f32 %v1424_v17, %v1669_v41  ;;  %v574_v24 = vadd.f32 %v1456_v18, %v1669_v41 }
 0x12c   :  { %v1425_v21 = vpop.f32.mrb[10].mxu0  ;;  %v1457_v22 = vpop.f32.mrb[10].mxu1  ;;  %v438_v29 = vadd.f32 %v1669_v41, %v437_v19  ;;  %v566_v30 = vadd.f32 %v1669_v41, %v565_v20 }
 0x12d   :  { %v449_v25 = vadd.f32 %v1425_v21, %v1669_v41  ;;  %v577_v26 = vadd.f32 %v1457_v22, %v1669_v41  ;;  %v440_v27 = vpop.f32.mrb[11].mxu0  ;;  %v568_v28 = vpop.f32.mrb[11].mxu1 }
 0x12e   :  { %v441_v31 = vadd.f32 %v1669_v41, %v440_v27  ;;  %v569_v32 = vadd.f32 %v1669_v41, %v568_v28 }
 0x12f   :  { %v1195_v33 = vpack.c.bf16 %v449_v25, %v446_v23  ;;  %v1275_v34 = vpack.c.bf16 %v577_v26, %v574_v24 }
 0x130   :  { %v1190_v35 = vpack.c.bf16 %v441_v31, %v438_v29  ;;  %v1270_v36 = vpack.c.bf16 %v569_v32, %v566_v30 }
 0x131   :  { %1331 = vst [vmem:[#allocation7 + $0x28] sm:$0xff] %v1195_v33   ;;  %1347 = vst [vmem:[#allocation7 + $0xa8] sm:$0xff] %v1275_v34  }
 0x132   :  { %1330 = vst [vmem:[#allocation7 + $0x20] sm:$0xff] %v1190_v35   ;;  %1346 = vst [vmem:[#allocation7 + $0xa0] sm:$0xff] %v1270_v36   ;;  %v1428_v37 = vpop.f32.mrb[12].mxu0  ;;  %v1460_v38 = vpop.f32.mrb[12].mxu1 }
 0x133   :  { %v453_v39 = vpop.f32.mrb[13].mxu0  ;;  %v581_v40 = vpop.f32.mrb[13].mxu1  ;;  %v462_v44 = vadd.f32 %v1428_v37, %v1669_v41  ;;  %v590_v45 = vadd.f32 %v1460_v38, %v1669_v41 }
 0x134   :  { %v1429_v42 = vpop.f32.mrb[14].mxu0  ;;  %v1461_v43 = vpop.f32.mrb[14].mxu1  ;;  %v454_v50 = vadd.f32 %v1669_v41, %v453_v39  ;;  %v582_v51 = vadd.f32 %v1669_v41, %v581_v40 }
 0x135   :  { %v465_v46 = vadd.f32 %v1429_v42, %v1669_v41  ;;  %v593_v47 = vadd.f32 %v1461_v43, %v1669_v41  ;;  %v456_v48 = vpop.f32.mrb[15].mxu0  ;;  %v584_v49 = vpop.f32.mrb[15].mxu1 }
 0x136   :  { %v457_v52 = vadd.f32 %v1669_v41, %v456_v48  ;;  %v585_v53 = vadd.f32 %v1669_v41, %v584_v49 }
 0x137   :  { %v1205_v54 = vpack.c.bf16 %v465_v46, %v462_v44  ;;  %v1285_v55 = vpack.c.bf16 %v593_v47, %v590_v45 }
 0x138   :  { %v1200_v56 = vpack.c.bf16 %v457_v52, %v454_v50  ;;  %v1280_v57 = vpack.c.bf16 %v585_v53, %v582_v51 }
 0x139   :  { %1333 = vst [vmem:[#allocation7 + $0x38] sm:$0xff] %v1205_v54   ;;  %1349 = vst [vmem:[#allocation7 + $0xb8] sm:$0xff] %v1285_v55  }
 0x13a   :  { %1332 = vst [vmem:[#allocation7 + $0x30] sm:$0xff] %v1200_v56   ;;  %1348 = vst [vmem:[#allocation7 + $0xb0] sm:$0xff] %v1280_v57   ;;  %v1432_v58 = vpop.f32.mrb[16].mxu0  ;;  %v1464_v59 = vpop.f32.mrb[16].mxu1 }
 0x13b   :  { %v469_v60 = vpop.f32.mrb[17].mxu0  ;;  %v597_v61 = vpop.f32.mrb[17].mxu1  ;;  %v478_v0 = vadd.f32 %v1432_v58, %v1669_v41  ;;  %v606_v1 = vadd.f32 %v1464_v59, %v1669_v41 }
 0x13c   :  { %v1433_v62 = vpop.f32.mrb[18].mxu0  ;;  %v1465_v63 = vpop.f32.mrb[18].mxu1  ;;  %v470_v6 = vadd.f32 %v1669_v41, %v469_v60  ;;  %v598_v7 = vadd.f32 %v1669_v41, %v597_v61 }
 0x13d   :  { %v481_v2 = vadd.f32 %v1433_v62, %v1669_v41  ;;  %v609_v3 = vadd.f32 %v1465_v63, %v1669_v41  ;;  %v472_v4 = vpop.f32.mrb[19].mxu0  ;;  %v600_v5 = vpop.f32.mrb[19].mxu1 }
 0x13e   :  { %v473_v8 = vadd.f32 %v1669_v41, %v472_v4  ;;  %v601_v9 = vadd.f32 %v1669_v41, %v600_v5 }
 0x13f   :  { %v1215_v10 = vpack.c.bf16 %v481_v2, %v478_v0  ;;  %v1295_v11 = vpack.c.bf16 %v609_v3, %v606_v1 }
 0x140   :  { %v1210_v12 = vpack.c.bf16 %v473_v8, %v470_v6  ;;  %v1290_v13 = vpack.c.bf16 %v601_v9, %v598_v7 }
 0x141   :  { %1335 = vst [vmem:[#allocation7 + $0x48] sm:$0xff] %v1215_v10   ;;  %1351 = vst [vmem:[#allocation7 + $0xc8] sm:$0xff] %v1295_v11  }
 0x142   :  { %1334 = vst [vmem:[#allocation7 + $0x40] sm:$0xff] %v1210_v12   ;;  %1350 = vst [vmem:[#allocation7 + $0xc0] sm:$0xff] %v1290_v13   ;;  %v1436_v14 = vpop.f32.mrb[20].mxu0  ;;  %v1468_v15 = vpop.f32.mrb[20].mxu1 }
 0x143   :  { %v485_v16 = vpop.f32.mrb[21].mxu0  ;;  %v613_v17 = vpop.f32.mrb[21].mxu1  ;;  %v494_v20 = vadd.f32 %v1436_v14, %v1669_v41  ;;  %v622_v21 = vadd.f32 %v1468_v15, %v1669_v41 }
 0x144   :  { %v1437_v18 = vpop.f32.mrb[22].mxu0  ;;  %v1469_v19 = vpop.f32.mrb[22].mxu1  ;;  %v486_v26 = vadd.f32 %v1669_v41, %v485_v16  ;;  %v614_v27 = vadd.f32 %v1669_v41, %v613_v17 }
 0x145   :  { %v497_v22 = vadd.f32 %v1437_v18, %v1669_v41  ;;  %v625_v23 = vadd.f32 %v1469_v19, %v1669_v41  ;;  %v488_v24 = vpop.f32.mrb[23].mxu0  ;;  %v616_v25 = vpop.f32.mrb[23].mxu1 }
 0x146   :  { %v489_v28 = vadd.f32 %v1669_v41, %v488_v24  ;;  %v617_v29 = vadd.f32 %v1669_v41, %v616_v25 }
 0x147   :  { %v1225_v30 = vpack.c.bf16 %v497_v22, %v494_v20  ;;  %v1305_v31 = vpack.c.bf16 %v625_v23, %v622_v21 }
 0x148   :  { %v1220_v32 = vpack.c.bf16 %v489_v28, %v486_v26  ;;  %v1300_v33 = vpack.c.bf16 %v617_v29, %v614_v27 }
 0x149   :  { %1337 = vst [vmem:[#allocation7 + $0x58] sm:$0xff] %v1225_v30   ;;  %1353 = vst [vmem:[#allocation7 + $0xd8] sm:$0xff] %v1305_v31  }
 0x14a   :  { %1336 = vst [vmem:[#allocation7 + $0x50] sm:$0xff] %v1220_v32   ;;  %1352 = vst [vmem:[#allocation7 + $0xd0] sm:$0xff] %v1300_v33   ;;  %v1440_v34 = vpop.f32.mrb[24].mxu0  ;;  %v1472_v35 = vpop.f32.mrb[24].mxu1 }
 0x14b   :  { %v501_v36 = vpop.f32.mrb[25].mxu0  ;;  %v629_v37 = vpop.f32.mrb[25].mxu1  ;;  %v510_v40 = vadd.f32 %v1440_v34, %v1669_v41  ;;  %v638_v42 = vadd.f32 %v1472_v35, %v1669_v41 }
 0x14c   :  { %v1441_v38 = vpop.f32.mrb[26].mxu0  ;;  %v1473_v39 = vpop.f32.mrb[26].mxu1  ;;  %v502_v47 = vadd.f32 %v1669_v41, %v501_v36  ;;  %v630_v48 = vadd.f32 %v1669_v41, %v629_v37 }
 0x14d   :  { %v513_v43 = vadd.f32 %v1441_v38, %v1669_v41  ;;  %v641_v44 = vadd.f32 %v1473_v39, %v1669_v41  ;;  %v504_v45 = vpop.f32.mrb[27].mxu0  ;;  %v632_v46 = vpop.f32.mrb[27].mxu1 }
 0x14e   :  { %v505_v49 = vadd.f32 %v1669_v41, %v504_v45  ;;  %v633_v50 = vadd.f32 %v1669_v41, %v632_v46 }
 0x14f   :  { %v1235_v51 = vpack.c.bf16 %v513_v43, %v510_v40  ;;  %v1315_v52 = vpack.c.bf16 %v641_v44, %v638_v42 }
 0x150   :  { %v1230_v53 = vpack.c.bf16 %v505_v49, %v502_v47  ;;  %v1310_v54 = vpack.c.bf16 %v633_v50, %v630_v48 }
 0x151   :  { %1339 = vst [vmem:[#allocation7 + $0x68] sm:$0xff] %v1235_v51   ;;  %1355 = vst [vmem:[#allocation7 + $0xe8] sm:$0xff] %v1315_v52  }
 0x152   :  { %1338 = vst [vmem:[#allocation7 + $0x60] sm:$0xff] %v1230_v53   ;;  %1354 = vst [vmem:[#allocation7 + $0xe0] sm:$0xff] %v1310_v54   ;;  %v1444_v55 = vpop.f32.mrb[28].mxu0  ;;  %v1476_v56 = vpop.f32.mrb[28].mxu1 }
 0x153   :  { %v517_v57 = vpop.f32.mrb[29].mxu0  ;;  %v645_v58 = vpop.f32.mrb[29].mxu1  ;;  %v526_v61 = vadd.f32 %v1444_v55, %v1669_v41  ;;  %v654_v62 = vadd.f32 %v1476_v56, %v1669_v41 }
 0x154   :  { %v1445_v59 = vpop.f32.mrb[30].mxu0  ;;  %v1477_v60 = vpop.f32.mrb[30].mxu1  ;;  %v518_v3 = vadd.f32 %v1669_v41, %v517_v57  ;;  %v646_v4 = vadd.f32 %v1669_v41, %v645_v58 }
 0x155   :  { %v529_v63 = vadd.f32 %v1445_v59, %v1669_v41  ;;  %v657_v0 = vadd.f32 %v1477_v60, %v1669_v41  ;;  %v520_v1 = vpop.f32.mrb[31].mxu0  ;;  %v648_v2 = vpop.f32.mrb[31].mxu1 }
 0x156   :  { %v521_v5 = vadd.f32 %v1669_v41, %v520_v1  ;;  %v649_v6 = vadd.f32 %v1669_v41, %v648_v2 }
 0x157   :  { %v1245_v7 = vpack.c.bf16 %v529_v63, %v526_v61  ;;  %v1325_v8 = vpack.c.bf16 %v657_v0, %v654_v62 }
 0x158   :  { %v1240_v9 = vpack.c.bf16 %v521_v5, %v518_v3  ;;  %v1320_v10 = vpack.c.bf16 %v649_v6, %v646_v4 }
 0x159   :  { %1341 = vst [vmem:[#allocation7 + $0x78] sm:$0xff] %v1245_v7   ;;  %1357 = vst [vmem:[#allocation7 + $0xf8] sm:$0xff] %v1325_v8  }
 0x15a   :  { %1340 = vst [vmem:[#allocation7 + $0x70] sm:$0xff] %v1240_v9   ;;  %1356 = vst [vmem:[#allocation7 + $0xf0] sm:$0xff] %v1320_v10  }
 0x15b   :  { %1594 = shalt.err (!%p1591_p6)
}
 0x15c   :  { %s1595_s15 = scalar_lea.hbm %s1753_s3, 4096 }
 0x15d   :  { %p1596_p7 = scmp.ne.s32.totalorder %s1753_s3, %s1595_s15  ;;  %p1599_p8 = scmp.lt.u32.totalorder %s1595_s15, %s1753_s3 }
 0x15f   :  { %p1601_p9 = pnand %p1599_p8, %p1596_p7 }
 0x161   :  { %1604 = shalt.err (!%p1601_p9)
}
 0x162   :  { %991 = dma.vmem_to_hbm [thread:$0]  %s986_s11, 4096, %s1753_s3, [#allocation4], %s1612_s22, %s1612_s22, %s1613_s23  }
 0x163   :  { %1609 = dma.done.wait [#allocation4], 4096  }
 0x164   :  { %1610 = vsyncadd [#allocation4], 4294963200 }
 0x165   :  { %995 = vsyncpa [#allocation3], 1 }
 0x166   :  { %996 = vsyncpa [#allocation6], 1 }
 0x167   :  { %997 = vsyncpa [#allocation4], 1 }

</bundles_post_ra>
